<compile_context>
chip_gen: v6e
topology: v6e:2x2x1
jax: 0.10.0
libtpu: 0.0.40
codegen_flags: <defaults>
</compile_context>

<pallas_src>
import functools

import jax
import jax.numpy as jnp
from jax.experimental import pallas as pl
from jax.experimental.pallas import tpu as pltpu


def _bmc2_kernel(sigma, margin, precise,
                 f_ref, row_ref, col_ref, odiag_ref, loss_ref):
    """Per-chunk loss partial for bmc2_loss (approach_type='cidm').

    f_ref     : (Bt, S, D) f32 features
    row_ref   : (Bt, S, 3) f32  [..., 0]=norm_inds, 1=abs_time, 2=|f|^2  (row form)
    col_ref   : (Bt, 3, S) f32  [:,0,:]=norm_inds, 1=abs_time, 2=|f|^2   (col form)
    odiag_ref : (1, S, S)  f32  1.0 off-diagonal, 0.0 on diagonal (constant block)
    loss_ref  : (1, 1, 1)  f32  sum of loss elements for this chunk
    """
    f = f_ref[...]
    if precise:
        gram = jnp.einsum('bsd,btd->bst', f, f,
                          preferred_element_type=jnp.float32)
    else:
        fb = f.astype(jnp.bfloat16)
        gram = jnp.einsum('bsd,btd->bst', fb, fb,
                          preferred_element_type=jnp.float32)

    rs = row_ref[...]                                       # (Bt, S, 3)
    cs = col_ref[...]                                       # (Bt, 3, S)
    n_r, t_r, sq_r = rs[:, :, 0:1], rs[:, :, 1:2], rs[:, :, 2:3]
    n_c, t_c, sq_c = cs[:, 0:1, :], cs[:, 1:2, :], cs[:, 2:3, :]

    # Pairwise euclidean distance: d2_ij = |f_i|^2 + |f_j|^2 - 2 f_i.f_j.
    # The resident off-diagonal mask forces the diagonal to an exact 0, matching
    # torch.cdist's exact self-distance.
    d2 = sq_r + sq_c - 2.0 * gram
    dist = jnp.sqrt(jnp.maximum(d2, 0.0)) * odiag_ref[...]  # (Bt, S, S)

    w_til = (n_r - n_c) ** 2 + 1.0                          # (Bt, S, S)
    mask = jnp.abs(t_r - t_c) > sigma                       # y_mask_only_temporal

    # cidm: imn = y_mask -> W_til-weighted hinge; imp = 1 - y_mask -> dist / W_til.
    if precise:
        neg_term = dist / w_til
    else:
        neg_term = dist * pl.reciprocal(w_til, approx=True)
    loss_elem = jnp.where(mask, w_til * jnp.maximum(margin - dist, 0.0), neg_term)
    loss_ref[...] = jnp.sum(loss_elem, keepdims=True)       # (1, 1, 1)


def _round_up(x, m):
    return -(-x // m) * m


def _vmem_capacity_bytes():
    try:
        return int(pltpu.get_tpu_info().vmem_capacity_bytes)
    except Exception:
        return 64 * 1024 * 1024          # conservative fallback (v7x per-TC VMEM)


def _per_step_vmem_bytes(bt, S, D):
    """Double-buffered BlockSpec footprint + estimated live (Bt,S,S) temporaries."""
    f32 = 4
    s8, s128, d128 = _round_up(S, 8), _round_up(S, 128), _round_up(D, 128)
    feat = 2 * bt * s8 * d128 * f32      # (Bt,S,D) features block, 2 buffers
    rows = 2 * bt * s8 * 128 * f32       # (Bt,S,3) row slab: lanes pad 3 -> 128
    cols = 2 * bt * 8 * s128 * f32       # (Bt,3,S) col slab: sublanes pad 3 -> 8
    odia = 2 * s8 * s128 * f32           # (1,S,S) off-diagonal mask (constant block)
    outp = 2 * 8 * 128 * f32             # (1,1,1) loss partial (padded)
    temp = 6 * bt * s8 * s128 * f32      # ~6 live (Bt,S,S) f32 intermediates
    return feat + rows + cols + odia + outp + temp


def _largest_divisor_leq(n, cap):
    for d in range(max(1, min(cap, n)), 0, -1):
        if n % d == 0:
            return d
    return 1


def _pick_batch_tile(B, S, D, budget_bytes):
    fits = [d for d in range(1, B + 1)
            if B % d == 0 and _per_step_vmem_bytes(d, S, D) <= budget_bytes]
    bt = max(fits) if fits else 1
    if B >= 2:
        # Keep >= 2 grid steps so v7x's second TensorCore gets work via the
        # "parallel" grid axis; costs one extra ~0.35 us step on single-TC chips.
        bt = min(bt, _largest_divisor_leq(B, B // 2))
    return bt


def bmc2_loss_forward(features, guide_mask, sampled_indices, og_seq_len,
                      per_video_fps, raw_features=None,
                      sigma=2.0, margin=1.0, absolute_sigma=True, precise=True):
    """JAX/Pallas equivalent of bmc2_loss.forward (approach_type='cidm')."""
    assert absolute_sigma, "only the absolute_sigma=True path is implemented"
    # TODO(synk): the guide-mask thresholding branch (float64 cdist of raw_features,
    # masked_select, threshold, guide_mask_thresholded) is dead code for
    # approach_type='cidm' and influences no returned value; it is omitted, so
    # raw_features / guide_mask are unused here.
    del raw_features, guide_mask

    f32 = jnp.float32
    features = features.astype(f32)
    B, S, D = features.shape

    norm_inds = sampled_indices.astype(f32) / og_seq_len.astype(f32)[:, None]    # (B, S)
    abs_time = sampled_indices.astype(f32) / per_video_fps.astype(f32)[:, None]  # (B, S)
    sq_norm = jnp.sum(features * features, axis=-1)                              # (B, S)

    row_slab = jnp.stack([norm_inds, abs_time, sq_norm], axis=-1)   # (B, S, 3)
    col_slab = jnp.stack([norm_inds, abs_time, sq_norm], axis=1)    # (B, 3, S)
    off_diag = (1.0 - jnp.eye(S, dtype=f32))[None]                  # (1, S, S)

    vmem_cap = _vmem_capacity_bytes()
    # 48 MiB on v7x (64 MiB/TC), 96 MiB on v5e/v6e (128 MiB), never below 32 MiB.
    vmem_limit = max(min(int(0.75 * vmem_cap), 96 * 1024 * 1024), 32 * 1024 * 1024)
    budget = vmem_limit - 4 * 1024 * 1024                           # internal-scratch headroom
    Bt = _pick_batch_tile(B, S, D, budget)
    n_chunks = B // Bt

    kernel = functools.partial(_bmc2_kernel, float(sigma), float(margin), bool(precise))

    partials = pl.pallas_call(
        kernel,
        out_shape=jax.ShapeDtypeStruct((n_chunks, 1, 1), f32),
        grid_spec=pltpu.PrefetchScalarGridSpec(
            num_scalar_prefetch=0,
            grid=(n_chunks,),
            in_specs=[
                pl.BlockSpec((Bt, S, D), lambda c: (c, 0, 0)),   # features
                pl.BlockSpec((Bt, S, 3), lambda c: (c, 0, 0)),   # row slab
                pl.BlockSpec((Bt, 3, S), lambda c: (c, 0, 0)),   # col slab
                pl.BlockSpec((1, S, S), lambda c: (0, 0, 0)),    # off-diag (resident)
            ],
            out_specs=pl.BlockSpec((1, 1, 1), lambda c: (c, 0, 0)),
        ),
        compiler_params=pltpu.CompilerParams(
            dimension_semantics=("parallel",),
            vmem_limit_bytes=vmem_limit,
        ),
    )(features, row_slab, col_slab, off_diag)

    loss = jnp.sum(partials) / jnp.asarray(B * S * S, f32)          # == .mean()

    # The returned (B,S,S) tensors depend only on the (B,S) vectors, so they are
    # produced with plain XLA broadcasts (fuse downstream) instead of being written
    # back from the kernel — the kernel's HBM writeback is one scalar per chunk.
    w_ij_til = (norm_inds[:, :, None] - norm_inds[:, None, :]) ** 2 + 1.0
    w_ij = 1.0 / w_ij_til
    y_mask = (jnp.abs(abs_time[:, :, None] - abs_time[:, None, :]) > sigma).astype(f32)
    inverted_mask_positive = 1.0 - y_mask
    inverted_mask_negative = y_mask
    return loss, (inverted_mask_positive, inverted_mask_negative, y_mask), w_ij_til, w_ij


def _reference_loss(features, sampled_indices, og_seq_len, per_video_fps, sigma, margin):
    f32 = jnp.float32
    f = features.astype(f32)
    norm = sampled_indices.astype(f32) / og_seq_len.astype(f32)[:, None]
    t = sampled_indices.astype(f32) / per_video_fps.astype(f32)[:, None]
    w_til = (norm[:, :, None] - norm[:, None, :]) ** 2 + 1.0
    y = (jnp.abs(t[:, :, None] - t[:, None, :]) > sigma).astype(f32)
    diff = f[:, :, None, :] - f[:, None, :, :]
    dist = jnp.sqrt(jnp.sum(diff * diff, axis=-1))
    loss = y * w_til * jnp.maximum(margin - dist, 0.0) + (1.0 - y) * dist / w_til
    return jnp.mean(loss)


if __name__ == "__main__":
    key = jax.random.PRNGKey(0)
    B, S, D = 2, 8, 32
    k1, k2, k3 = jax.random.split(key, 3)

    features = jax.random.normal(k1, (B, S, D), jnp.float32)
    raw_features = jax.random.normal(k2, (B, S, D), jnp.float32)
    og_seq_len = jnp.array([100.0, 120.0], jnp.float32)
    per_video_fps = jnp.array([25.0, 30.0], jnp.float32)
    sampled_indices = jnp.sort(
        jax.random.uniform(k3, (B, S), jnp.float32) * og_seq_len[:, None], axis=-1)
    guide_mask = jnp.ones((B, S, S - 1), dtype=jnp.bool_)   # shape-only in torch module

    loss, masks, w_ij_til, w_ij = bmc2_loss_forward(
        features, guide_mask, sampled_indices, og_seq_len, per_video_fps,
        raw_features=raw_features, sigma=2.0, margin=1.0, absolute_sigma=True)
    jax.block_until_ready((loss, masks, w_ij_til, w_ij))

    assert loss.shape == ()
    assert masks[0].shape == (B, S, S) and masks[1].shape == (B, S, S)
    assert masks[2].shape == (B, S, S)
    assert w_ij_til.shape == (B, S, S) and w_ij.shape == (B, S, S)

    ref = _reference_loss(features, sampled_indices, og_seq_len, per_video_fps, 2.0, 1.0)
    assert jnp.allclose(loss, ref, rtol=1e-3, atol=1e-5), (loss, ref)
    print("KERNEL_OK")
</pallas_src>

<mosaic_0001>
module attributes {stable_mosaic.version = 11 : i64} {
  func.func @_bmc2_kernel(%arg0: i32, %arg1: memref<1x8x32xf32, #tpu.memory_space<vmem>>, %arg2: memref<1x8x3xf32, #tpu.memory_space<vmem>>, %arg3: memref<1x3x8xf32, #tpu.memory_space<vmem>>, %arg4: memref<1x8x8xf32, #tpu.memory_space<vmem>>, %arg5: memref<1x1x1xf32, #tpu.memory_space<vmem>>) attributes {dimension_semantics = [#tpu.dimension_semantics<parallel>], iteration_bounds = array<i64: 2>, scalar_prefetch = 0 : i64, scratch_operands = 0 : i64, tpu.core_type = #tpu.core_type<tc>, window_params = [{transform_indices = @transform_0, window_bounds = array<i64: 1, 8, 32>}, {transform_indices = @transform_1, window_bounds = array<i64: 1, 8, 3>}, {transform_indices = @transform_2, window_bounds = array<i64: 1, 3, 8>}, {pipeline_mode = #tpu.pipeline_mode<synchronous>, transform_indices = @transform_3, window_bounds = array<i64: 1, 8, 8>}, {transform_indices = @transform_4, window_bounds = array<i64: 1, 1, 1>}]} {
    %c0 = arith.constant 0 : index
    %c0_0 = arith.constant 0 : index
    %c0_1 = arith.constant 0 : index
    %0 = vector.load %arg1[%c0, %c0_0, %c0_1] : memref<1x8x32xf32, #tpu.memory_space<vmem>>, vector<1x8x32xf32>
    "tpu.trace_start"() <{level = 10 : i32, message = "bsd,btd->bst"}> : () -> ()
    %cst = arith.constant dense<0.000000e+00> : vector<1x8x8xf32>
    %1 = tpu.matmul %0, %0, %cst {dimension_numbers = #tpu.dot_dimension_numbers<[2], [2], [1], [1], [0, 0, 0, 1, 1, 1], [0], [0]>} : vector<1x8x32xf32>, vector<1x8x32xf32>, vector<1x8x8xf32> -> vector<1x8x8xf32>
    "tpu.trace_stop"() : () -> ()
    %c0_2 = arith.constant 0 : index
    %c0_3 = arith.constant 0 : index
    %c0_4 = arith.constant 0 : index
    %2 = vector.load %arg2[%c0_2, %c0_3, %c0_4] : memref<1x8x3xf32, #tpu.memory_space<vmem>>, vector<1x8x3xf32>
    %c0_5 = arith.constant 0 : index
    %c0_6 = arith.constant 0 : index
    %c0_7 = arith.constant 0 : index
    %3 = vector.load %arg3[%c0_5, %c0_6, %c0_7] : memref<1x3x8xf32, #tpu.memory_space<vmem>>, vector<1x3x8xf32>
    %4 = vector.extract_strided_slice %2 {offsets = [0, 0, 0], sizes = [1, 8, 1], strides = [1, 1, 1]} : vector<1x8x3xf32> to vector<1x8x1xf32>
    %5 = vector.extract_strided_slice %2 {offsets = [0, 0, 1], sizes = [1, 8, 1], strides = [1, 1, 1]} : vector<1x8x3xf32> to vector<1x8x1xf32>
    %6 = vector.extract_strided_slice %2 {offsets = [0, 0, 2], sizes = [1, 8, 1], strides = [1, 1, 1]} : vector<1x8x3xf32> to vector<1x8x1xf32>
    %7 = vector.extract_strided_slice %3 {offsets = [0, 0, 0], sizes = [1, 1, 8], strides = [1, 1, 1]} : vector<1x3x8xf32> to vector<1x1x8xf32>
    %8 = vector.extract_strided_slice %3 {offsets = [0, 1, 0], sizes = [1, 1, 8], strides = [1, 1, 1]} : vector<1x3x8xf32> to vector<1x1x8xf32>
    %9 = vector.extract_strided_slice %3 {offsets = [0, 2, 0], sizes = [1, 1, 8], strides = [1, 1, 1]} : vector<1x3x8xf32> to vector<1x1x8xf32>
    %10 = vector.broadcast %6 : vector<1x8x1xf32> to vector<1x8x8xf32>
    %11 = vector.broadcast %9 : vector<1x1x8xf32> to vector<1x8x8xf32>
    %12 = arith.addf %10, %11 : vector<1x8x8xf32>
    %cst_8 = arith.constant 2.000000e+00 : f32
    %13 = vector.broadcast %cst_8 : f32 to vector<1x8x8xf32>
    %14 = arith.mulf %13, %1 : vector<1x8x8xf32>
    %15 = arith.subf %12, %14 : vector<1x8x8xf32>
    %cst_9 = arith.constant 0.000000e+00 : f32
    %16 = vector.broadcast %cst_9 : f32 to vector<1x8x8xf32>
    %17 = arith.maximumf %15, %16 : vector<1x8x8xf32>
    %18 = math.sqrt %17 : vector<1x8x8xf32>
    %c0_10 = arith.constant 0 : index
    %c0_11 = arith.constant 0 : index
    %c0_12 = arith.constant 0 : index
    %19 = vector.load %arg4[%c0_10, %c0_11, %c0_12] : memref<1x8x8xf32, #tpu.memory_space<vmem>>, vector<1x8x8xf32>
    %20 = arith.mulf %18, %19 : vector<1x8x8xf32>
    %21 = vector.broadcast %4 : vector<1x8x1xf32> to vector<1x8x8xf32>
    %22 = vector.broadcast %7 : vector<1x1x8xf32> to vector<1x8x8xf32>
    %23 = arith.subf %21, %22 : vector<1x8x8xf32>
    %24 = arith.mulf %23, %23 : vector<1x8x8xf32>
    %cst_13 = arith.constant 1.000000e+00 : f32
    %25 = vector.broadcast %cst_13 : f32 to vector<1x8x8xf32>
    %26 = arith.addf %24, %25 : vector<1x8x8xf32>
    %27 = vector.broadcast %5 : vector<1x8x1xf32> to vector<1x8x8xf32>
    %28 = vector.broadcast %8 : vector<1x1x8xf32> to vector<1x8x8xf32>
    %29 = arith.subf %27, %28 : vector<1x8x8xf32>
    %30 = math.absf %29 : vector<1x8x8xf32>
    %cst_14 = arith.constant 2.000000e+00 : f32
    %31 = vector.broadcast %cst_14 : f32 to vector<1x8x8xf32>
    %32 = arith.cmpf ogt, %30, %31 : vector<1x8x8xf32>
    %33 = arith.divf %20, %26 : vector<1x8x8xf32>
    %cst_15 = arith.constant 1.000000e+00 : f32
    %34 = vector.broadcast %cst_15 : f32 to vector<1x8x8xf32>
    %35 = arith.subf %34, %20 : vector<1x8x8xf32>
    %cst_16 = arith.constant 0.000000e+00 : f32
    %36 = vector.broadcast %cst_16 : f32 to vector<1x8x8xf32>
    %37 = arith.maximumf %35, %36 : vector<1x8x8xf32>
    %38 = arith.mulf %26, %37 : vector<1x8x8xf32>
    %39 = arith.select %32, %38, %33 : vector<1x8x8xi1>, vector<1x8x8xf32>
    %40 = vector.shape_cast %39 : vector<1x8x8xf32> to vector<1x1x8x8xf32>
    %cst_17 = arith.constant dense<0.000000e+00> : vector<1xf32>
    %41 = vector.multi_reduction <add>, %40, %cst_17 [1, 2, 3] : vector<1x1x8x8xf32> to vector<1xf32>
    %42 = vector.shape_cast %41 : vector<1xf32> to vector<1x1x1x1xf32>
    %43 = vector.extract %42[0, 0, 0, 0] : f32 from vector<1x1x1x1xf32>
    %44 = vector.broadcast %43 : f32 to vector<1x1x1xf32>
    %c0_18 = arith.constant 0 : index
    %c0_19 = arith.constant 0 : index
    %c0_20 = arith.constant 0 : index
    %45 = vector.load %arg5[%c0_18, %c0_19, %c0_20] : memref<1x1x1xf32, #tpu.memory_space<vmem>>, vector<1x1x1xf32>
    tpu.vector_store %arg5[%c0_18, %c0_19, %c0_20], %44 {strides = array<i32>} : memref<1x1x1xf32, #tpu.memory_space<vmem>>, vector<1x1x1xf32>,
    return
  }
  func.func @transform_0(%arg0: i32) -> (i32, i32, i32) {
    %c0_i32 = arith.constant 0 : i32
    %c0_i32_0 = arith.constant 0 : i32
    %c0_i32_1 = arith.constant 0 : i32
    return %arg0, %c0_i32, %c0_i32_0 : i32, i32, i32
  }
  func.func @transform_1(%arg0: i32) -> (i32, i32, i32) {
    %c0_i32 = arith.constant 0 : i32
    %c0_i32_0 = arith.constant 0 : i32
    %c0_i32_1 = arith.constant 0 : i32
    return %arg0, %c0_i32, %c0_i32_0 : i32, i32, i32
  }
  func.func @transform_2(%arg0: i32) -> (i32, i32, i32) {
    %c0_i32 = arith.constant 0 : i32
    %c0_i32_0 = arith.constant 0 : i32
    %c0_i32_1 = arith.constant 0 : i32
    return %arg0, %c0_i32, %c0_i32_0 : i32, i32, i32
  }
  func.func @transform_3(%arg0: i32) -> (i32, i32, i32) {
    %c0_i32 = arith.constant 0 : i32
    %c0_i32_0 = arith.constant 0 : i32
    %c0_i32_1 = arith.constant 0 : i32
    %c0_i32_2 = arith.constant 0 : i32
    return %c0_i32, %c0_i32_0, %c0_i32_1 : i32, i32, i32
  }
  func.func @transform_4(%arg0: i32) -> (i32, i32, i32) {
    %c0_i32 = arith.constant 0 : i32
    %c0_i32_0 = arith.constant 0 : i32
    %c0_i32_1 = arith.constant 0 : i32
    return %arg0, %c0_i32, %c0_i32_0 : i32, i32, i32
  }
}

</mosaic_0001>

<bundles_post_ra>
// kernel: tpu_custom_call.1
= control target key start
LH: loop header
LB: loop body
LE: loop exit
PB: predicated region body
PF: predicated region fallthrough
CT: control target
= control target key end

     0   :  { %s517_s15 = smov 0   ;;  %s548_s0 = inlined_call_operand.vmem [shape: f32[2,8,32], index: 0, kind: input, shape index: {}]   ;;  %s549_s1 = inlined_call_operand.vmem [shape: f32[2,8,3], index: 1, kind: input, shape index: {}]   ;;  %s550_s2 = inlined_call_operand.vmem [shape: f32[2,3,8], index: 2, kind: input, shape index: {}]   ;;  %s551_s3 = inlined_call_operand.vmem [shape: f32[1,8,8], index: 3, kind: input, shape index: {}]   ;;  %s552_s4 = inlined_call_operand.vmem [shape: f32[2,1,1], index: 4, kind: output, shape index: {}]  }
   0x1 LB: > { %s437_s16 = sadd.s32 4294967295, %s485_s15   ;;  %p441_p0 = scmp.ge.s32.totalorder %s485_s15, 1  ;;  %s485_s15 = sphi %s517_s15, %s14_s15  }
   0x2   : > { %p179_p1 = scmp.lt.s32.totalorder %s485_s15, 3 }
   0x4   : > { %p180_p2 = pnand %p441_p0, %p179_p1 }
   0x5   : > { %p210_p3 = scmp.lt.s32.totalorder (!%p180_p2), %s437_s16, 1 }
   0x6   : > { %183 = sbr.rel (%p180_p2) target bundleno = 447 (0x1bf), region = 36 }
   0xb   : > { %v487_v0 = vmov 0.0   ;;  %vm488_vm0 = vmmov 0   ;;  %s554_s16 = smov (!%p210_p3, %s437_s16), 1  ;;  %v489_v1 = vmov 2   ;;  %v490_v2 = vmov 1   ;;  %v322_v29 = vld [vmem:[%s551_s3] sm:$0xff] }
   0xc   : > { %451 = vmatprep.subr.mxu0 %v487_v0  ;;  %453 = vmatprep.mubr.msk.f32.mxu0 %vm488_vm0, %v487_v0  ;;  %s442_s17 = sshll.u32 %s554_s16, 3  ;;  %vm226_vm1 = vcmask 261120   ;;  %v491_v5 = vmov 0   ;;  %v307_v6 = vlaneseq  ;;  %s444_s24 = sshll.u32 %s554_s16, 2  ;;  %vm352_vm5 = vcmask 64512  }
   0xd   : > { %471 = vset.pattern.permute.xlu0 %v489_v1  ;;  %473 = vset.pattern.permute.xlu1 %v490_v2  ;;  %s213_s20 = scalar_lea.vmem %s548_s0, %s442_s17  ;;  %s217_s23 = scalar_lea.vmem %s549_s1, %s442_s17  ;;  %vm364_vm6 = vcmask 0  }
   0xe   : > { %v225_v3 = vld [vmem:[%s213_s20] sm:$0xff]  ;;  %v308_v7 = vshrl.u32 %v307_v6, 7  ;;  %s221_s27 = scalar_lea.vmem %s550_s2, %s444_s24  ;;  %s224_s6 = scalar_lea.vmem %s552_s4, %s554_s16 }
   0xf   : > { %v300_v4 = vld [vmem:[%s217_s23] sm:$0xff]  ;;  %452 = vmatpush3.xpose.msk.msra.mxu0 %vm226_vm1, %v225_v3 }
  0x10   : > { %304 = vperm.xlu0 %471, %v300_v4   ;;  %336 = vperm.xlu1 %473, %v300_v4   ;;  %v309_v8 = vsub.s32 2, %v308_v7  ;;  %v301_v9 = vld [vmem:[%s221_s27] sm:$0x7]  ;;  %v330_v11 = vsub.s32 0, %v308_v7  ;;  %v341_v24 = vsub.s32 1, %v308_v7 }
  0x12   : > { %454 = vmatmul.mubr.msk.f32.vlgmr.msra.gmra.mxu0 %vm226_vm1, %v225_v3  ;;  %v310_v10 = vrot.slane %v301_v9, %v309_v8  ;;  %v331_v14 = vrot.slane %v301_v9, %v330_v11  ;;  %v342_v25 = vrot.slane %v301_v9, %v341_v24 }
  0x14   : > { %472 = vset.pattern.permute.xlu0 %v491_v5 }
  0x15   : > { %325 = vperm.xlu0 %472, %v300_v4  }
  0x19   : > { %474 = vset.pattern.permute.xlu0 %v490_v2 }
  0x8b   : > { %v305_v12 = vpop.permute.xlu0 %304  ;;  %v337_v26 = vpop.permute.xlu1 %336 }
  0x8c   : > { %v311_v13 = vadd.f32 %v310_v10, %v305_v12  ;;  %v343_v31 = vsub.f32 %v337_v26, %v342_v25 }
  0x8e   : > { %v344_v35 = vand.u32 2147483647, %v343_v31 }
  0x90   : > { %v326_v16 = vpop.permute.xlu0 %325  ;;  %vm345_vm4 = vcmp.gt.f32.partialorder %v344_v35, 2.0 }
  0x91   : > { %v332_v20 = vsub.f32 %v326_v16, %v331_v14 }
  0x93   : > { %v333_v22 = vmul.f32 %v332_v20, %v332_v20 }
  0x95   : > { %v334_v23 = vadd.f32 1.0, %v333_v22 }
  0xd2   : > { %v296_v15 = vpop.f32.mrf.mxu0 }
  0xd3   : > { %v312_v17 = vmul.f32 2.0, %v296_v15 }
  0xd4   : > { %v455_v18 = vpop.f32.mrf.mxu0 }
  0xd5   : > { %v313_v19 = vsub.f32 %v311_v13, %v312_v17 }
  0xd7   : > { %v314_v21 = vmax.f32 %v313_v19, 0.0 }
  0xd9   : > { %475 = vrsqrt.f32 %v314_v21  ;;  %vm317_vm2 = vcmp.eq.f32.partialorder %v314_v21, inf  ;;  %v320_v30 = vand.u32 2147483648, %v314_v21  ;;  %vm319_vm3 = vcmp.eq.f32.partialorder %v314_v21, 0.0 }
  0xda   : > { %477 = vrcp.f32 %v334_v23 }
  0xe6   : > { %v476_v27 = vpop.eup %475 }
  0xe7   : > { %v316_v28 = vmul.f32 %v476_v27, %v314_v21  ;;  %v478_v37 = vpop.eup %477 }
  0xe9   : > { %v318_v32 = vsel %vm317_vm2, %v314_v21, %v316_v28 }
  0xea   : > { %v321_v33 = vsel %vm319_vm3, %v320_v30, %v318_v32 }
  0xeb   : > { %v323_v34 = vmul.f32 %v322_v29, %v321_v33 }
  0xed   : > { %v348_v36 = vsub.f32 1.0, %v323_v34  ;;  %v347_v40 = vmul.f32 %v478_v37, %v323_v34 }
  0xef   : > { %v349_v38 = vmax.f32 %v348_v36, 0.0 }
  0xf1   : > { %v350_v39 = vmul.f32 %v349_v38, %v334_v23 }
  0xf3   : > { %v351_v41 = vsel %vm345_vm4, %v350_v39, %v347_v40 }
  0xf4   : > { %v353_v42 = vsel %vm352_vm5, %v351_v41, 0.0 }
  0xf5   : > { %354 = vadd.xlane.f32.xlu1 %v353_v42 }
 0x17e   : > { %v355_v43 = vpop.xlane.xlu1 %354 }
 0x17f   : > { %v356_v44 = vrot.slane %v355_v43, 4 }
 0x181   : > { %v357_v45 = vadd.f32 %v356_v44, %v355_v43 }
 0x183   : > { %v358_v46 = vrot.slane %v357_v45, 2 }
 0x185   : > { %v359_v47 = vadd.f32 %v358_v46, %v357_v45 }
 0x187   : > { %v360_v48 = vrot.slane %v359_v47, 1 }
 0x189   : > { %v361_v49 = vadd.f32 %v360_v48, %v359_v47 }
 0x18b   : > { %456 = vpush %v361_v49 }
 0x1bc   : > { %s457_s7 = spop %456 }
 0x1bd   : > { %v363_v50 = vstv %s457_s7 }
 0x1be   : > { %365 = vst.msk [vmem:[%s224_s6] sm:$0x1] %vm364_vm6, %v363_v50 }
 0x1bf PF: > { %s14_s15 = sadd.s32 1, %s485_s15  }
 0x1c0   : > { %p11_p4 = scmp.ge.s32.totalorder %s14_s15, 4  }
 0x1c2   :  { %13 = sbr.rel (!%p11_p4) target bundleno = 1 (0x1), region = 72 }

</bundles_post_ra>
